<compile_context>
chip_gen: v6e
topology: v6e:2x2x1
jax: 0.10.0
libtpu: 0.0.40
codegen_flags: <defaults>
</compile_context>

<pallas_src>
import math

import jax
import jax.numpy as jnp
from jax import lax
from jax.experimental import pallas as pl
from jax.experimental.pallas import tpu as pltpu


def _sdpa_flash_kernel(q_ref, k_ref, v_ref, mask_ref, o_ref, m_sc, l_sc, acc_sc):
    # Block shapes: q (1,Tq,D), k/v (1,Tkv,D), mask (1,Tq,Tkv), out (1,Tq,D).
    kv_i = pl.program_id(2)

    @pl.when(kv_i == 0)
    def _init():
        m_sc[...] = jnp.full_like(m_sc, -jnp.inf)
        l_sc[...] = jnp.zeros_like(l_sc)
        acc_sc[...] = jnp.zeros_like(acc_sc)

    # Fold 1/sqrt(d_head) into Q (small O(Tq*D) multiply) and keep the native
    # dtype so the MXU runs at full rate; accumulation is f32 via
    # preferred_element_type.
    d_head = q_ref.shape[-1]
    scale = 1.0 / math.sqrt(float(d_head))
    q = q_ref[0] * jnp.asarray(scale, dtype=q_ref.dtype)       # [Tq, D]
    k = k_ref[0]                                               # [Tkv, D]
    v = v_ref[0]                                               # [Tkv, D]

    # scores = (Q * scale) @ K^T + mask, contracting last dims directly
    # (no explicit transpose -> no XLU pass on the K tile).
    scores = lax.dot_general(
        q, k, (((1,), (1,)), ((), ())),
        preferred_element_type=jnp.float32,
    ) + mask_ref[0].astype(jnp.float32)                        # [Tq, Tkv]

    # Online (flash) softmax update against the running (m, l, acc) state.
    m_prev = m_sc[...]                                         # [Tq, 1]
    m_new = jnp.maximum(m_prev, jnp.max(scores, axis=-1, keepdims=True))
    alpha = jnp.exp(m_prev - m_new)                            # rescale factor
    p = jnp.exp(scores - m_new)                                # [Tq, Tkv] f32
    l_sc[...] = alpha * l_sc[...] + jnp.sum(p, axis=-1, keepdims=True)
    acc_sc[...] = alpha * acc_sc[...] + jnp.dot(
        p.astype(v.dtype), v, preferred_element_type=jnp.float32)
    m_sc[...] = m_new

    @pl.when(kv_i == pl.num_programs(2) - 1)
    def _finalize():
        inv_l = pl.reciprocal(l_sc[...], approx=True)          # EUP vrcp, ~free
        o_ref[0] = (acc_sc[...] * inv_l).astype(o_ref.dtype)


def _pick_tile(size, target, granularity):
    """Largest divisor of `size` that is <= target and a multiple of
    `granularity`; falls back to the full size (always a legal block)."""
    if size <= target:
        return size
    t = (target // granularity) * granularity
    while t >= granularity:
        if size % t == 0:
            return t
        t -= granularity
    return size


def scaled_dot_product_attention(Q, K, V, mask, *, block_q=128, block_kv=256):
    """Q, K, V: [B, H, S, D]; mask: additive [B, H, S, S]. Returns [B, H, S, D]."""
    B, H, S, D = Q.shape
    BH = B * H

    q = Q.reshape(BH, S, D)
    k = K.reshape(BH, S, D)
    v = V.reshape(BH, S, D)
    m = mask.reshape(BH, S, S)

    Tq = _pick_tile(S, block_q, 8)      # sublane granularity
    Tkv = _pick_tile(S, block_kv, 128)  # lane granularity (mask last dim)

    grid = (BH, S // Tq, S // Tkv)

    q_spec = pl.BlockSpec((1, Tq, D), lambda b, qi, ki: (b, qi, 0))
    kv_spec = pl.BlockSpec((1, Tkv, D), lambda b, qi, ki: (b, ki, 0))
    mask_spec = pl.BlockSpec((1, Tq, Tkv), lambda b, qi, ki: (b, qi, ki))
    out_spec = pl.BlockSpec((1, Tq, D), lambda b, qi, ki: (b, qi, 0))

    out = pl.pallas_call(
        _sdpa_flash_kernel,
        out_shape=jax.ShapeDtypeStruct((BH, S, D), Q.dtype),
        grid_spec=pltpu.PrefetchScalarGridSpec(
            num_scalar_prefetch=0,
            grid=grid,
            in_specs=[q_spec, kv_spec, kv_spec, mask_spec],
            out_specs=out_spec,
            scratch_shapes=[
                pltpu.VMEM((Tq, 1), jnp.float32),   # running row max
                pltpu.VMEM((Tq, 1), jnp.float32),   # running denominator
                pltpu.VMEM((Tq, D), jnp.float32),   # f32 output accumulator
            ],
        ),
        compiler_params=pltpu.CompilerParams(
            # BH and q-block axes are independent (megacore / v7x 2-TC
            # sharding); kv axis is the reduction -> last + arbitrary.
            dimension_semantics=("parallel", "parallel", "arbitrary"),
            vmem_limit_bytes=32 * 1024 * 1024,
        ),
    )(q, k, v, m)

    return out.reshape(B, H, S, D)


def _reference(Q, K, V, mask):
    d_head = Q.shape[-1]
    scores = jnp.einsum(
        "bhqd,bhkd->bhqk", Q.astype(jnp.float32), K.astype(jnp.float32)
    ) / jnp.sqrt(jnp.float32(d_head))
    scores = scores + mask.astype(jnp.float32)
    attn = jax.nn.softmax(scores, axis=-1)
    return jnp.einsum("bhqk,bhkd->bhqd", attn, V.astype(jnp.float32))


def _causal_mask(B, H, S):
    tri = jnp.tril(jnp.ones((S, S), dtype=jnp.float32))
    m = jnp.where(tri == 1.0, 0.0, -1e9)
    return jnp.broadcast_to(m, (B, H, S, S))


if __name__ == "__main__":
    # Small config matching the module's axis convention.
    batch, n_heads, seq_len, d_head = 2, 4, 8, 32
    kq, kk, kv_, _ = jax.random.split(jax.random.PRNGKey(0), 4)
    Q = jax.random.normal(kq, (batch, n_heads, seq_len, d_head), jnp.float32)
    K = jax.random.normal(kk, (batch, n_heads, seq_len, d_head), jnp.float32)
    V = jax.random.normal(kv_, (batch, n_heads, seq_len, d_head), jnp.float32)
    mask = _causal_mask(batch, n_heads, seq_len)

    out = jax.block_until_ready(scaled_dot_product_attention(Q, K, V, mask))
    ref = _reference(Q, K, V, mask)
    assert out.shape == (batch, n_heads, seq_len, d_head)
    assert jnp.allclose(out, ref, atol=2e-2, rtol=2e-2), float(
        jnp.max(jnp.abs(out - ref)))

    # Slightly larger config that exercises real (Tq, Tkv) tiling and the
    # online-softmax accumulation across multiple kv steps.
    B2, H2, S2, D2 = 1, 2, 256, 64
    k1, k2, k3 = jax.random.split(jax.random.PRNGKey(1), 3)
    Q2 = jax.random.normal(k1, (B2, H2, S2, D2), jnp.float32)
    K2 = jax.random.normal(k2, (B2, H2, S2, D2), jnp.float32)
    V2 = jax.random.normal(k3, (B2, H2, S2, D2), jnp.float32)
    mask2 = _causal_mask(B2, H2, S2)
    out2 = jax.block_until_ready(
        scaled_dot_product_attention(Q2, K2, V2, mask2, block_q=128, block_kv=128))
    ref2 = _reference(Q2, K2, V2, mask2)
    assert jnp.allclose(out2, ref2, atol=2e-2, rtol=2e-2), float(
        jnp.max(jnp.abs(out2 - ref2)))

    print("KERNEL_OK")
</pallas_src>

<mosaic_0001>
module attributes {stable_mosaic.version = 11 : i64} {
  func.func @_sdpa_flash_kernel(%arg0: i32, %arg1: i32, %arg2: i32, %arg3: memref<1x8x32xf32, #tpu.memory_space<vmem>>, %arg4: memref<1x8x32xf32, #tpu.memory_space<vmem>>, %arg5: memref<1x8x32xf32, #tpu.memory_space<vmem>>, %arg6: memref<1x8x8xf32, #tpu.memory_space<vmem>>, %arg7: memref<1x8x32xf32, #tpu.memory_space<vmem>>, %arg8: memref<8x1xf32, #tpu.memory_space<vmem>>, %arg9: memref<8x1xf32, #tpu.memory_space<vmem>>, %arg10: memref<8x32xf32, #tpu.memory_space<vmem>>) attributes {dimension_semantics = [#tpu.dimension_semantics<parallel>, #tpu.dimension_semantics<parallel>, #tpu.dimension_semantics<arbitrary>], iteration_bounds = array<i64: 8, 1, 1>, scalar_prefetch = 0 : i64, scratch_operands = 3 : i64, tpu.core_type = #tpu.core_type<tc>, window_params = [{transform_indices = @transform_0, window_bounds = array<i64: 1, 8, 32>}, {transform_indices = @transform_1, window_bounds = array<i64: 1, 8, 32>}, {transform_indices = @transform_2, window_bounds = array<i64: 1, 8, 32>}, {transform_indices = @transform_3, window_bounds = array<i64: 1, 8, 8>}, {transform_indices = @transform_4, window_bounds = array<i64: 1, 8, 32>}]} {
    %c0_i32 = arith.constant 0 : i32
    %0 = arith.cmpi eq, %arg2, %c0_i32 : i32
    %1 = arith.extui %0 : i1 to i32
    %c0_i32_0 = arith.constant 0 : i32
    %2 = arith.cmpi ne, %1, %c0_i32_0 : i32
    scf.if %2 {
      %cst_30 = arith.constant 0xFF800000 : f32
      %40 = vector.broadcast %cst_30 : f32 to vector<8x1xf32>
      %c0_31 = arith.constant 0 : index
      %c0_32 = arith.constant 0 : index
      %41 = vector.load %arg8[%c0_31, %c0_32] : memref<8x1xf32, #tpu.memory_space<vmem>>, vector<8x1xf32>
      tpu.vector_store %arg8[%c0_31, %c0_32], %40 {strides = array<i32>} : memref<8x1xf32, #tpu.memory_space<vmem>>, vector<8x1xf32>,
      %cst_33 = arith.constant 0.000000e+00 : f32
      %42 = vector.broadcast %cst_33 : f32 to vector<8x1xf32>
      %c0_34 = arith.constant 0 : index
      %c0_35 = arith.constant 0 : index
      %43 = vector.load %arg9[%c0_34, %c0_35] : memref<8x1xf32, #tpu.memory_space<vmem>>, vector<8x1xf32>
      tpu.vector_store %arg9[%c0_34, %c0_35], %42 {strides = array<i32>} : memref<8x1xf32, #tpu.memory_space<vmem>>, vector<8x1xf32>,
      %cst_36 = arith.constant 0.000000e+00 : f32
      %44 = vector.broadcast %cst_36 : f32 to vector<8x32xf32>
      %c0_37 = arith.constant 0 : index
      %c0_38 = arith.constant 0 : index
      %45 = vector.load %arg10[%c0_37, %c0_38] : memref<8x32xf32, #tpu.memory_space<vmem>>, vector<8x32xf32>
      tpu.vector_store %arg10[%c0_37, %c0_38], %44 {strides = array<i32>} : memref<8x32xf32, #tpu.memory_space<vmem>>, vector<8x32xf32>,
    } else {
    }
    %c0 = arith.constant 0 : index
    %c0_1 = arith.constant 0 : index
    %c0_2 = arith.constant 0 : index
    %3 = vector.load %arg3[%c0, %c0_1, %c0_2] : memref<1x8x32xf32, #tpu.memory_space<vmem>>, vector<1x8x32xf32>
    %4 = vector.shape_cast %3 : vector<1x8x32xf32> to vector<8x32xf32>
    %cst = arith.constant 0.176776692 : f32
    %5 = vector.broadcast %cst : f32 to vector<8x32xf32>
    %6 = arith.mulf %4, %5 : vector<8x32xf32>
    %c0_3 = arith.constant 0 : index
    %c0_4 = arith.constant 0 : index
    %c0_5 = arith.constant 0 : index
    %7 = vector.load %arg4[%c0_3, %c0_4, %c0_5] : memref<1x8x32xf32, #tpu.memory_space<vmem>>, vector<1x8x32xf32>
    %8 = vector.shape_cast %7 : vector<1x8x32xf32> to vector<8x32xf32>
    %c0_6 = arith.constant 0 : index
    %c0_7 = arith.constant 0 : index
    %c0_8 = arith.constant 0 : index
    %9 = vector.load %arg5[%c0_6, %c0_7, %c0_8] : memref<1x8x32xf32, #tpu.memory_space<vmem>>, vector<1x8x32xf32>
    %10 = vector.shape_cast %9 : vector<1x8x32xf32> to vector<8x32xf32>
    %cst_9 = arith.constant dense<0.000000e+00> : vector<8x8xf32>
    %11 = tpu.matmul %6, %8, %cst_9 {dimension_numbers = #tpu.dot_dimension_numbers<[1], [1], [0], [0], [0, 0, 1, 0], [], []>} : vector<8x32xf32>, vector<8x32xf32>, vector<8x8xf32> -> vector<8x8xf32>
    %c0_10 = arith.constant 0 : index
    %c0_11 = arith.constant 0 : index
    %c0_12 = arith.constant 0 : index
    %12 = vector.load %arg6[%c0_10, %c0_11, %c0_12] : memref<1x8x8xf32, #tpu.memory_space<vmem>>, vector<1x8x8xf32>
    %13 = vector.shape_cast %12 : vector<1x8x8xf32> to vector<8x8xf32>
    %14 = arith.addf %11, %13 : vector<8x8xf32>
    %c0_13 = arith.constant 0 : index
    %c0_14 = arith.constant 0 : index
    %15 = vector.load %arg8[%c0_13, %c0_14] : memref<8x1xf32, #tpu.memory_space<vmem>>, vector<8x1xf32>
    %cst_15 = arith.constant dense<0xFF800000> : vector<8xf32>
    %16 = vector.multi_reduction <maximumf>, %14, %cst_15 [1] : vector<8x8xf32> to vector<8xf32>
    %17 = vector.shape_cast %16 : vector<8xf32> to vector<8x1xf32>
    %18 = arith.maximumf %15, %17 : vector<8x1xf32>
    %19 = arith.subf %15, %18 : vector<8x1xf32>
    %20 = math.exp %19 : vector<8x1xf32>
    %21 = vector.broadcast %18 : vector<8x1xf32> to vector<8x8xf32>
    %22 = arith.subf %14, %21 : vector<8x8xf32>
    %23 = math.exp %22 : vector<8x8xf32>
    %c0_16 = arith.constant 0 : index
    %c0_17 = arith.constant 0 : index
    %24 = vector.load %arg9[%c0_16, %c0_17] : memref<8x1xf32, #tpu.memory_space<vmem>>, vector<8x1xf32>
    %25 = arith.mulf %20, %24 : vector<8x1xf32>
    %cst_18 = arith.constant dense<0.000000e+00> : vector<8xf32>
    %26 = vector.multi_reduction <add>, %23, %cst_18 [1] : vector<8x8xf32> to vector<8xf32>
    %27 = vector.shape_cast %26 : vector<8xf32> to vector<8x1xf32>
    %28 = arith.addf %25, %27 : vector<8x1xf32>
    %c0_19 = arith.constant 0 : index
    %c0_20 = arith.constant 0 : index
    %29 = vector.load %arg9[%c0_19, %c0_20] : memref<8x1xf32, #tpu.memory_space<vmem>>, vector<8x1xf32>
    tpu.vector_store %arg9[%c0_19, %c0_20], %28 {strides = array<i32>} : memref<8x1xf32, #tpu.memory_space<vmem>>, vector<8x1xf32>,
    %c0_21 = arith.constant 0 : index
    %c0_22 = arith.constant 0 : index
    %30 = vector.load %arg10[%c0_21, %c0_22] : memref<8x32xf32, #tpu.memory_space<vmem>>, vector<8x32xf32>
    %31 = vector.broadcast %20 : vector<8x1xf32> to vector<8x32xf32>
    %32 = arith.mulf %31, %30 : vector<8x32xf32>
    %cst_23 = arith.constant dense<0.000000e+00> : vector<8x32xf32>
    %33 = tpu.matmul %23, %10, %cst_23 {dimension_numbers = #tpu.dot_dimension_numbers<[1], [0], [0], [1], [0, 0, 1, 1], [], []>} : vector<8x8xf32>, vector<8x32xf32>, vector<8x32xf32> -> vector<8x32xf32>
    %34 = arith.addf %32, %33 : vector<8x32xf32>
    %c0_24 = arith.constant 0 : index
    %c0_25 = arith.constant 0 : index
    %35 = vector.load %arg10[%c0_24, %c0_25] : memref<8x32xf32, #tpu.memory_space<vmem>>, vector<8x32xf32>
    tpu.vector_store %arg10[%c0_24, %c0_25], %34 {strides = array<i32>} : memref<8x32xf32, #tpu.memory_space<vmem>>, vector<8x32xf32>,
    %c0_26 = arith.constant 0 : index
    %c0_27 = arith.constant 0 : index
    %36 = vector.load %arg8[%c0_26, %c0_27] : memref<8x1xf32, #tpu.memory_space<vmem>>, vector<8x1xf32>
    tpu.vector_store %arg8[%c0_26, %c0_27], %18 {strides = array<i32>} : memref<8x1xf32, #tpu.memory_space<vmem>>, vector<8x1xf32>,
    %c0_i32_28 = arith.constant 0 : i32
    %37 = arith.cmpi eq, %arg2, %c0_i32_28 : i32
    %38 = arith.extui %37 : i1 to i32
    %c0_i32_29 = arith.constant 0 : i32
    %39 = arith.cmpi ne, %38, %c0_i32_29 : i32
    scf.if %39 {
      %c0_30 = arith.constant 0 : index
      %c0_31 = arith.constant 0 : index
      %40 = vector.load %arg9[%c0_30, %c0_31] : memref<8x1xf32, #tpu.memory_space<vmem>>, vector<8x1xf32>
      %41 = tpu.reciprocal %40 {approx = true} : vector<8x1xf32> -> vector<8x1xf32>
      %c0_32 = arith.constant 0 : index
      %c0_33 = arith.constant 0 : index
      %42 = vector.load %arg10[%c0_32, %c0_33] : memref<8x32xf32, #tpu.memory_space<vmem>>, vector<8x32xf32>
      %43 = vector.broadcast %41 : vector<8x1xf32> to vector<8x32xf32>
      %44 = arith.mulf %42, %43 : vector<8x32xf32>
      %c0_34 = arith.constant 0 : index
      %c0_35 = arith.constant 0 : index
      %c0_36 = arith.constant 0 : index
      %45 = vector.load %arg7[%c0_34, %c0_35, %c0_36] : memref<1x8x32xf32, #tpu.memory_space<vmem>>, vector<1x8x32xf32>
      %46 = vector.shape_cast %45 : vector<1x8x32xf32> to vector<8x32xf32>
      %47 = vector.shape_cast %44 : vector<8x32xf32> to vector<1x8x32xf32>
      tpu.vector_store %arg7[%c0_34, %c0_35, %c0_36], %47 {strides = array<i32>} : memref<1x8x32xf32, #tpu.memory_space<vmem>>, vector<1x8x32xf32>,
    } else {
    }
    return
  }
  func.func @transform_0(%arg0: i32, %arg1: i32, %arg2: i32) -> (i32, i32, i32) {
    %c0_i32 = arith.constant 0 : i32
    %c0_i32_0 = arith.constant 0 : i32
    return %arg0, %arg1, %c0_i32 : i32, i32, i32
  }
  func.func @transform_1(%arg0: i32, %arg1: i32, %arg2: i32) -> (i32, i32, i32) {
    %c0_i32 = arith.constant 0 : i32
    %c0_i32_0 = arith.constant 0 : i32
    return %arg0, %arg2, %c0_i32 : i32, i32, i32
  }
  func.func @transform_2(%arg0: i32, %arg1: i32, %arg2: i32) -> (i32, i32, i32) {
    %c0_i32 = arith.constant 0 : i32
    %c0_i32_0 = arith.constant 0 : i32
    return %arg0, %arg2, %c0_i32 : i32, i32, i32
  }
  func.func @transform_3(%arg0: i32, %arg1: i32, %arg2: i32) -> (i32, i32, i32) {
    %c0_i32 = arith.constant 0 : i32
    return %arg0, %arg1, %arg2 : i32, i32, i32
  }
  func.func @transform_4(%arg0: i32, %arg1: i32, %arg2: i32) -> (i32, i32, i32) {
    %c0_i32 = arith.constant 0 : i32
    %c0_i32_0 = arith.constant 0 : i32
    return %arg0, %arg1, %c0_i32 : i32, i32, i32
  }
}

</mosaic_0001>

<bundles_post_ra>
// kernel: tpu_custom_call.1
= control target key start
LH: loop header
LB: loop body
LE: loop exit
PB: predicated region body
PF: predicated region fallthrough
CT: control target
= control target key end

     0   :  { %s1328_s0 = inlined_call_operand.hbm [shape: f32[8,8,32], index: 0, kind: input, shape index: {}]   ;;  %s1329_s1 = inlined_call_operand.hbm [shape: f32[8,8,32], index: 1, kind: input, shape index: {}]   ;;  %s1330_s2 = inlined_call_operand.hbm [shape: f32[8,8,32], index: 2, kind: input, shape index: {}]   ;;  %s1331_s3 = inlined_call_operand.hbm [shape: f32[8,8,8], index: 3, kind: input, shape index: {}]   ;;  %s1332_s4 = inlined_call_operand.hbm [shape: f32[8,8,32], index: 4, kind: output, shape index: {}]  }
   0x1   :  { %1336 = sst [smem:[#allocation22_spill]] %s1329_s1 }
   0x2   :  { %9 = vsyncpa [#allocation6], 0 }
   0x3   :  { %11 = vsyncpa [#allocation6 + $0x1], 0 }
   0x4   :  { %12 = vsyncpa [#allocation9], 0 }
   0x5   :  { %14 = vsyncpa [#allocation9 + $0x1], 0 }
   0x6   :  { %15 = vsyncpa [#allocation12], 0 }
   0x7   :  { %17 = vsyncpa [#allocation12 + $0x1], 0 }
   0x8   :  { %18 = vsyncpa [#allocation7], 0 }
   0x9   :  { %20 = vsyncpa [#allocation7 + $0x1], 0  ;;  %s1101_s15 = smov 0   ;;  %s1103_s16 = smov 0  }
   0xa   :  { %s1105_s17 = smov 0   ;;  %s1107_s18 = smov 0  }
   0xb   :  { %s1109_s19 = smov 0   ;;  %s1111_s20 = smov 0  }
   0xc LB: > { %1337 = sst [smem:[#allocation18_spill]] %s1053_s17  ;;  %s1132_s21 = sadd.s32 4294967295, %s1065_s20   ;;  %s1065_s20 = sphi %s1111_s20, %s26_s20   ;;  %s1061_s19 = sphi %s1109_s19, %s1351_s19   ;;  %s1057_s18 = sphi %s1107_s18, %s1350_s18   ;;  %s1053_s17 = sphi %s1105_s17, %s1349_s17   ;;  %s1049_s16 = sphi %s1103_s16, %s1353_s16   ;;  %s1045_s15 = sphi %s1101_s15, %s1352_s15  }
   0xd   : > { %1338 = sst [smem:[#allocation19_spill]] %s1061_s19  ;;  %s738_s22 = sadd.s32 4294967294, %s1065_s20  }
   0xe   : > { %s45_s23 = sadd.s32 1, %s1061_s19  ;;  %s54_s24 = sadd.s32 1, %s1053_s17 }
   0xf   : > { %p47_p0 = scmp.ge.s32.totalorder %s45_s23, 8  ;;  %p61_p1 = scmp.ne.s32.totalorder %s1053_s17, %s1049_s16 }
  0x10   : > { %p62_p2 = scmp.eq.s32.totalorder %s1065_s20, 0  ;;  %p67_p3 = scmp.ne.s32.totalorder %s1049_s16, %s1045_s15 }
  0x11   : > { %s1355_s23 = smov (%p47_p0, %s45_s23), 0  ;;  %p68_p5 = scmp.eq.s32.totalorder %s1132_s21, 0 }
  0x12   : > { %1339 = sst [smem:[#allocation20_spill]] %s1355_s23  ;;  %p1144_p4 = por %p62_p2, %p61_p1 }
  0x13   : > { %s49_s26 = ssub.s32 %s1061_s19, %s1355_s23  ;;  %p179_p6 = scmp.eq.s32.totalorder %s1132_s21, 7 }
  0x14   : > { %p52_p7 = scmp.eq.s32.totalorder %s49_s26, 0  ;;  %p1152_p8 = por %p68_p5, %p67_p3 }
  0x15   : > { %p1156_p9 = por %p179_p6, %p61_p1  ;;  %p185_p10 = scmp.eq.s32.totalorder %s738_s22, 7 }
  0x16   : > { %s1161_s29 = scalar_select %p52_p7, %s1053_s17, %s54_s24  }
  0x17   : > { %p1163_p11 = por %p185_p10, %p67_p3  ;;  %p803_p12 = scmp.lt.s32.totalorder %s1065_s20, 8 }
  0x18   : > { %1343 = sst [smem:[#allocation21_spill]] %s1161_s29  ;;  %s1169_s5 = sand.u32 1, %s1053_s17  }
  0x19   : > { %s1172_s6 = sshll.u32 %s1169_s5, 3  ;;  %s1175_s7 = sshll.u32 %s1061_s19, 7 }
  0x1a   : > { %p1179_p13 = pnand %p803_p12, %p1144_p4  ;;  %s224_s9 = sand.u32 1, %s1065_s20  }
  0x1b   : > { %s1346_s1 = sld [smem:[#allocation22_spill]]  ;;  %s228_s13 = scalar_lea.vmem [#allocation8], %s1172_s6 }
  0x1c   : > { %s236_s14 = sshll.u32 %s228_s13, 4  ;;  %p749_p0 = scmp.ge.s32.totalorder %s1065_s20, 1  ;;  %s237_s14 = int_to_ptr.vmem [resolvable:$true] %s236_s14 }
  0x1d   : > { %p280_p1 = scmp.lt.s32.totalorder %s1065_s20, 9  ;;  %s1191_s22 = scalar_lea.sflag [#allocation9], %s224_s9 }
  0x1e   : > { %p867_p2 = pneg %p1179_p13  ;;  %s878_s24 = scalar_lea.vmem %s237_s14, 128 }
  0x1f   : > { %p879_p3 = scmp.ne.s32.totalorder %s237_s14, %s878_s24  ;;  %s1067_s25 = smov [#allocation8]  }
  0x20   : > { %s883_s26 = sshll.u32 %s1067_s25, 4  ;;  %s884_s26 = int_to_ptr.vmem [resolvable:$false] %s883_s26 }
  0x21   : > { %s234_s12 = scalar_lea.hbm %s1346_s1, %s1175_s7  ;;  %p881_p4 = pnand %p879_p3, %p867_p2 }
  0x22   : > { %s885_s10 = scalar_lea.vmem %s884_s26, 256  ;;  %p886_p6 = scmp.lt.s32.totalorder %s237_s14, %s884_s26 }
  0x23   : > { %p882_p5 = pneg %p881_p4  ;;  %p887_p7 = scmp.lt.s32.totalorder %s885_s10, %s878_s24 }
  0x25   : > { %p888_p10 = por %p887_p7, %p886_p6 }
  0x27   : > { %p889_p12 = pnand %p888_p10, %p882_p5 }
  0x29   : > { %892 = shalt.err (!%p889_p12)
}
  0x2a   : > { %792 = dma.hbm_to_vmem [thread:$0]  (!%p1179_p13), %s234_s12, 128, %s237_s14, %s1191_s22  }
  0x2b   : > { %p1205_p3 = pnand %p749_p0, %p280_p1  ;;  %s215_s24 = scalar_lea.hbm %s1328_s0, %s1175_s7 }
  0x2c   : > { %s209_s25 = scalar_lea.vmem [#allocation5], %s1172_s6  ;;  %s253_s23 = scalar_lea.hbm %s1330_s2, %s1175_s7 }
  0x2d   : > { %s217_s26 = sshll.u32 %s209_s25, 4  ;;  %s206_s19 = scalar_lea.sflag [#allocation6], %s1169_s5  ;;  %s218_s26 = int_to_ptr.vmem [resolvable:$true] %s217_s26 }
  0x2e   : > { %s906_s29 = scalar_lea.vmem %s218_s26, 128  ;;  %s1068_s12 = smov [#allocation5]  }
  0x2f   : > { %p907_p4 = scmp.ne.s32.totalorder %s218_s26, %s906_s29  ;;  %s911_s14 = sshll.u32 %s1068_s12, 4  ;;  %s912_s14 = int_to_ptr.vmem [resolvable:$false] %s911_s14 }
  0x30   : > { %s913_s17 = scalar_lea.vmem %s912_s14, 256  ;;  %p914_p5 = scmp.lt.s32.totalorder %s218_s26, %s912_s14 }
  0x31   : > { %p909_p0 = pnand %p907_p4, %p867_p2  ;;  %p915_p6 = scmp.lt.s32.totalorder %s913_s17, %s906_s29 }
  0x33   : > { %p910_p1 = pneg %p909_p0  ;;  %p916_p7 = por %p915_p6, %p914_p5 }
  0x35   : > { %p917_p10 = pnand %p916_p7, %p910_p1 }
  0x37   : > { %920 = shalt.err (!%p917_p10)
}
  0x38   : > { %789 = dma.hbm_to_vmem [thread:$0]  (!%p1179_p13), %s215_s24, 128, %s218_s26, %s206_s19  }
  0x39   : > { %s247_s1 = scalar_lea.vmem [#allocation10], %s1172_s6  ;;  %s1069_s25 = smov [#allocation10]  }
  0x3a   : > { %s255_s11 = sshll.u32 %s247_s1, 4  ;;  %s939_s10 = sshll.u32 %s1069_s25, 4  ;;  %s256_s11 = int_to_ptr.vmem [resolvable:$true] %s255_s11  ;;  %s940_s10 = int_to_ptr.vmem [resolvable:$false] %s939_s10 }
  0x3b   : > { %s934_s13 = scalar_lea.vmem %s256_s11, 128  ;;  %s941_s17 = scalar_lea.vmem %s940_s10, 256 }
  0x3c   : > { %p935_p12 = scmp.ne.s32.totalorder %s256_s11, %s934_s13  ;;  %p942_p1 = scmp.lt.s32.totalorder %s256_s11, %s940_s10 }
  0x3d   : > { %p943_p5 = scmp.lt.s32.totalorder %s941_s17, %s934_s13 }
  0x3e   : > { %p937_p4 = pnand %p935_p12, %p867_p2 }
  0x3f   : > { %p944_p6 = por %p943_p5, %p942_p1 }
  0x40   : > { %p938_p0 = pneg %p937_p4 }
  0x42   : > { %p945_p7 = pnand %p944_p6, %p938_p0 }
  0x44   : > { %948 = shalt.err (!%p945_p7)
}
  0x45   : > { %795 = dma.hbm_to_vmem [thread:$0]  (!%p1179_p13), %s253_s23, 128, %s256_s11, %s1191_s22  }
  0x46   : > { %s273_s12 = scalar_lea.hbm %s1331_s3, %s1175_s7  ;;  %s266_s14 = scalar_lea.vmem [#allocation11], %s1172_s6 }
  0x47   : > { %s275_s1 = sshll.u32 %s266_s14, 4  ;;  %s263_s13 = scalar_lea.sflag [#allocation12], %s1169_s5  ;;  %s276_s1 = int_to_ptr.vmem [resolvable:$true] %s275_s1 }
  0x48   : > { %s962_s25 = scalar_lea.vmem %s276_s1, 128  ;;  %s1070_s10 = smov [#allocation11]  }
  0x49   : > { %p963_p10 = scmp.ne.s32.totalorder %s276_s1, %s962_s25  ;;  %s967_s17 = sshll.u32 %s1070_s10, 4  ;;  %s968_s17 = int_to_ptr.vmem [resolvable:$false] %s967_s17 }
  0x4a   : > { %s969_s19 = scalar_lea.vmem %s968_s17, 256  ;;  %p970_p0 = scmp.lt.s32.totalorder %s276_s1, %s968_s17 }
  0x4b   : > { %p965_p12 = pnand %p963_p10, %p867_p2  ;;  %p971_p1 = scmp.lt.s32.totalorder %s969_s19, %s962_s25 }
  0x4d   : > { %p966_p4 = pneg %p965_p12  ;;  %p972_p5 = por %p971_p1, %p970_p0 }
  0x4f   : > { %p973_p6 = pnand %p972_p5, %p966_p4 }
  0x51   : > { %976 = shalt.err (!%p973_p6)
}
  0x52   : > { %798 = dma.hbm_to_vmem [thread:$0]  (!%p1179_p13), %s273_s12, 128, %s276_s1, %s263_s13  }
  0x53   : > { %284 = sbr.rel (%p1205_p3) target bundleno = 881 (0x371), region = 36  ;;  %s1250_s23 = sand.u32 (!%p1205_p3), 1, %s1049_s16  }
  0x54   : > { %s1253_s5 = sshll.u32 (!%p1205_p3), %s1250_s23, 3  ;;  %s287_s6 = scalar_lea.sflag (!%p1205_p3), [#allocation6], %s1250_s23 }
  0x55   : > { %s290_s7 = scalar_lea.vmem (!%p1205_p3), [#allocation5], %s1253_s5 }
  0x58   : > { %1028 = dma.done.wait (%p1152_p8), %s287_s6, 128  }
  0x59   : > { %1030 = vsyncadd (%p1152_p8), %s287_s6, 4294967168  ;;  %s295_s8 = sand.u32 1, %s1132_s21   ;;  %s299_s9 = scalar_lea.vmem [#allocation8], %s1253_s5 }
  0x5a   : > { %s296_s22 = scalar_lea.sflag [#allocation9], %s295_s8 }
  0x5b   : > { %1032 = dma.done.wait (%p1152_p8), %s296_s22, 256  }
  0x5c   : > { %1034 = vsyncadd (%p1152_p8), %s296_s22, 4294967040  ;;  %s308_s11 = scalar_lea.vmem [#allocation10], %s1253_s5  ;;  %s314_s29 = scalar_lea.sflag [#allocation12], %s1250_s23 }
  0x5d   : > { %s317_s24 = scalar_lea.vmem [#allocation11], %s1253_s5 }
  0x5e   : > { %1036 = dma.done.wait (%p1152_p8), %s314_s29, 128  }
  0x5f   : > { %1038 = vsyncadd (%p1152_p8), %s314_s29, 4294967168  ;;  %vm364_vm0 = vcmask 261120   ;;  %v1071_v0 = vmov 0.0   ;;  %vm1072_vm1 = vmmov 0   ;;  %v368_v1 = vld [vmem:[%s299_s9] sm:$0xff]  ;;  %v366_v2 = vld [vmem:[%s290_s7] sm:$0xff] }
  0x60   : > { %766 = vmatprep.subr.mxu0 %v1071_v0  ;;  %365 = vst.msk [vmem:[#allocation4] sm:$0xff] %vm364_vm0, %v1071_v0  ;;  %768 = vmatprep.mubr.msk.f32.mxu0 %vm1072_vm1, %v1071_v0  ;;  %v367_v3 = vmul.f32 0.17677669, %v366_v2  ;;  %vm361_vm2 = vcmask 7168   ;;  %v1073_v4 = vmov -inf   ;;  %v370_v5 = vld [vmem:[%s317_s24] sm:$0xff] }
  0x61   : > { %771 = vmatprep.subr.mxu1 %v1071_v0  ;;  %773 = vmatprep.mubr.msk.f32.mxu1 %vm1072_vm1, %v1071_v0  ;;  %362 = vst.msk [vmem:[#allocation2] sm:$0xff] %vm361_vm2, %v1073_v4  ;;  %363 = vst.msk [vmem:[#allocation3] sm:$0xff] %vm361_vm2, %v1071_v0  ;;  %vm449_vm3 = vcmask 64512   ;;  %v1074_v10 = vmov 0   ;;  %v369_v15 = vld [vmem:[%s308_s11] sm:$0xff]  ;;  %s759_s21 = sshll.u32 %s1057_s18, 7 }
  0x62   : > { %767 = vmatpush3.xpose.msk.msra.mxu0 %vm364_vm0, %v368_v1  ;;  %857 = vset.pattern.permute.xlu0 %v1074_v10  ;;  %s356_s27 = scalar_lea.vmem [#allocation13], %s1253_s5  ;;  %s582_s1 = scalar_lea.hbm %s1332_s4, %s759_s21 }
  0x63   : > { %858 = vset.pattern.permute.xlu1 %v1074_v10  ;;  %772 = vmatpush3.msra.mxu1 %v369_v15  ;;  %s584_s26 = sshll.u32 %s356_s27, 4  ;;  %s570_s13 = scalar_lea.sflag [#allocation7], %s1250_s23  ;;  %s585_s26 = int_to_ptr.vmem [resolvable:$true] %s584_s26 }
  0x64   : > { %s977_s25 = scalar_lea.vmem %s585_s26, 128  ;;  %s1075_s10 = smov [#allocation13]  }
  0x65   : > { %769 = vmatmul.mubr.msk.f32.vlgmr.msra.gmra.mxu0 %vm364_vm0, %v367_v3  ;;  %p978_p8 = scmp.ne.s32.totalorder %s585_s26, %s977_s25  ;;  %s981_s18 = sshll.u32 %s1075_s10, 4  ;;  %s982_s18 = int_to_ptr.vmem [resolvable:$false] %s981_s18 }
  0x66   : > { %s983_s17 = scalar_lea.vmem %s982_s18, 256  ;;  %p984_p3 = scmp.lt.s32.totalorder %s585_s26, %s982_s18 }
  0x67   : > { %v473_v29 = vld [vmem:[#allocation4] sm:$0xff]  ;;  %p979_p13 = pnand %p978_p8, %p1156_p9  ;;  %p985_p7 = scmp.lt.s32.totalorder %s983_s17, %s977_s25 }
  0x68   : > { %v448_v11 = vld [vmem:[#allocation2] sm:$0xff]  ;;  %v465_v23 = vld [vmem:[#allocation3] sm:$0xff] }
  0x69   : > { %p980_p2 = pneg %p979_p13  ;;  %p986_p10 = por %p985_p7, %p984_p3 }
  0x6b   : > { %p987_p12 = pnand %p986_p10, %p980_p2 }
 0x125   : > { %v444_v6 = vpop.f32.mrf.mxu0 }
 0x126   : > { %v445_v7 = vadd.f32 %v444_v6, %v370_v5 }
 0x127   : > { %v770_v8 = vpop.f32.mrf.mxu0 }
 0x128   : > { %v450_v9 = vsel %vm449_vm3, %v445_v7, -inf }
 0x129   : > { %451 = vmax.xlane.f32.xlu0 %v450_v9 }
 0x1b2   : > { %v452_v12 = vpop.xlane.xlu0 %451 }
 0x1b3   : > { %v453_v13 = vmax.f32 %v448_v11, %v452_v12 }
 0x1b5   : > { %v454_v14 = vsub.f32 %v448_v11, %v453_v13  ;;  %555 = vst.msk [vmem:[#allocation2] sm:$0xff] %vm361_vm2, %v453_v13  ;;  %459 = vperm.xlu0 %857, %v453_v13  }
 0x1b7   : > { %v455_v20 = vmul.f32 1.442695, %v454_v14 }
 0x230   : > { %v460_v16 = vpop.permute.xlu0 %459 }
 0x231   : > { %v462_v17 = vsub.f32 %v445_v7, %v460_v16 }
 0x233   : > { %v463_v18 = vmul.f32 1.442695, %v462_v17 }
 0x235   : > { %859 = vpow2.f32 %v463_v18 }
 0x236   : > { %861 = vpow2.f32 %v455_v20 }
 0x242   : > { %v860_v19 = vpop.eup %859 }
 0x243   : > { %774 = vmatmul.mubr.msk.f32.vlgmr.msra.gmra.mxu1 %vm449_vm3, %v860_v19  ;;  %v467_v21 = vsel %vm449_vm3, %v860_v19, 0.0  ;;  %v862_v22 = vpop.eup %861 }
 0x244   : > { %468 = vadd.xlane.f32.xlu1 %v467_v21  ;;  %v466_v24 = vmul.f32 %v862_v22, %v465_v23 }
 0x255   : > { %476 = vperm.xlu1 %858, %v862_v22  }
 0x2cd   : > { %v469_v25 = vpop.xlane.xlu1 %468 }
 0x2ce   : > { %v470_v26 = vadd.f32 %v469_v25, %v466_v24 }
 0x2d0   : > { %472 = vst.msk [vmem:[#allocation3] sm:$0xff] %vm361_vm2, %v470_v26 }
 0x2d1   : > { %v477_v30 = vpop.permute.xlu1 %476 }
 0x2d2   : > { %v479_v31 = vmul.f32 %v477_v30, %v473_v29 }
 0x2d7   : > { %v559_v27 = vld [vmem:[#allocation3] sm:$0xff] }
 0x2d8   : > { %863 = vrcp.f32 %v559_v27 }
 0x2e5   : > { %v864_v28 = vpop.eup %863 }
 0x2e6   : > { %564 = vperm.xlu1 %858, %v864_v28  }
 0x303   : > { %v549_v32 = vpop.f32.mrf.mxu1 }
 0x304   : > { %v553_v33 = vadd.f32 %v549_v32, %v479_v31 }
 0x305   : > { %v775_v34 = vpop.f32.mrf.mxu1 }
 0x306   : > { %554 = vst.msk [vmem:[#allocation4] sm:$0xff] %vm364_vm0, %v553_v33 }
 0x30d   : > { %v561_v35 = vld [vmem:[#allocation4] sm:$0xff] }
 0x361   : > { %v565_v36 = vpop.permute.xlu1 %564 }
 0x362   : > { %v567_v37 = vmul.f32 %v565_v36, %v561_v35 }
 0x364   : > { %568 = vst.msk [vmem:[%s356_s27] sm:$0xff] %vm364_vm0, %v567_v37 }
 0x365   : > { %990 = shalt.err (!%p987_p12)
}
 0x366   : > { %s991_s19 = scalar_lea.hbm %s582_s1, 128  ;;  %s995_s6 = scalar_lea.hbm %s1332_s4, 1024 }
 0x367   : > { %p992_p4 = scmp.ne.s32.totalorder %s582_s1, %s991_s19  ;;  %p996_p5 = scmp.lt.s32.totalorder %s582_s1, %s1332_s4 }
 0x368   : > { %p997_p6 = scmp.lt.s32.totalorder %s995_s6, %s991_s19 }
 0x369   : > { %p993_p0 = pnand %p992_p4, %p1156_p9 }
 0x36a   : > { %p998_p8 = por %p997_p6, %p996_p5 }
 0x36b   : > { %p994_p1 = pneg %p993_p0 }
 0x36d   : > { %p999_p13 = pnand %p998_p8, %p994_p1 }
 0x36f   : > { %1002 = shalt.err (!%p999_p13)
}
 0x370   : > { %784 = dma.vmem_to_hbm [thread:$0]  (%p1156_p9), %s585_s26, 128, %s582_s1, %s570_s13  }
 0x371 PF: > { %p804_p2 = scmp.ge.s32.totalorder %s1065_s20, 2  ;;  %s596_s22 = sand.u32 1, %s1045_s15  }
 0x372   : > { %s597_s9 = scalar_lea.sflag [#allocation7], %s596_s22 }
 0x373   : > { %p800_p3 = pnand %p804_p2, %p1163_p11 }
 0x375   : > { %p801_p7 = pneg %p800_p3 }
 0x377   : > { %1040 = dma.done.wait (%p801_p7), %s597_s9, 128  }
 0x378   : > { %1042 = vsyncadd (%p801_p7), %s597_s9, 4294967168  ;;  %s26_s20 = sadd.s32 1, %s1065_s20   ;;  %s1348_s11 = sld [smem:[#allocation18_spill]] }
 0x379   : > { %p23_p10 = scmp.ge.s32.totalorder %s26_s20, 10   ;;  %s1349_s17 = sld [smem:[#allocation21_spill]] }
 0x37a   : > { %s1350_s18 = sld [smem:[#allocation19_spill]]  ;;  %s1352_s15 = smov %s1049_s16 }
 0x37b   : > { %s1351_s19 = sld [smem:[#allocation20_spill]]  ;;  %25 = sbr.rel (!%p23_p10) target bundleno = 12 (0xc), region = 126 }
 0x37e   : > { %s1353_s16 = smov %s1348_s11 }
 0x380   :  { %602 = vsyncpa [#allocation6], 1 }
 0x381   :  { %604 = vsyncpa [#allocation6 + $0x1], 1 }
 0x382   :  { %605 = vsyncpa [#allocation9], 1 }
 0x383   :  { %607 = vsyncpa [#allocation9 + $0x1], 1 }
 0x384   :  { %608 = vsyncpa [#allocation12], 1 }
 0x385   :  { %610 = vsyncpa [#allocation12 + $0x1], 1 }
 0x386   :  { %611 = vsyncpa [#allocation7], 1 }
 0x387   :  { %613 = vsyncpa [#allocation7 + $0x1], 1 }

</bundles_post_ra>
